<compile_context>
chip_gen: v7x
topology: tpu7x:2x2x1
jax: 0.10.0
libtpu: 0.0.40
codegen_flags: <defaults>
</compile_context>

<pallas_src>
import functools
import math

import jax
import jax.numpy as jnp
from jax.experimental import pallas as pl
from jax.experimental.pallas import tpu as pltpu


_SQRT_2_OVER_PI = math.sqrt(2.0 / math.pi)
_LANES = 128


def _gelu_kernel(x_ref, o_ref):
    # Upcast to f32 for the VPU/EUP work (no-op for f32 inputs; required for
    # bf16 on v5e which has no bf16 vector datapath); store back in the
    # original dtype so HBM traffic stays at the input width.
    x = x_ref[...].astype(jnp.float32)
    inner = _SQRT_2_OVER_PI * (x + 0.044715 * (x * x * x))
    y = 0.5 * x * (1.0 + jnp.tanh(inner))
    o_ref[...] = y.astype(o_ref.dtype)


def _round_up(v: int, m: int) -> int:
    return ((v + m - 1) // m) * m


def _sublane_multiple(dtype) -> int:
    # Min second-minor tiling: 8 rows for 4-byte, 16 for 2-byte, 32 for 1-byte.
    return max(8, 32 // jnp.dtype(dtype).itemsize)


@functools.lru_cache(maxsize=1)
def _num_tensorcores() -> int:
    """Best-effort count of TensorCores per chip (v7x = 2, v5e/v6e = 1)."""
    try:
        dev = jax.devices()[0]
        if getattr(dev, "platform", "") != "tpu":
            return 1
        nc = getattr(dev, "num_cores", None)
        if isinstance(nc, int) and nc > 0:
            return nc
        kind = str(getattr(dev, "device_kind", "")).lower()
        if "v7" in kind:
            return 2
    except Exception:
        pass
    return 1


def _choose_tiles(rows, cols, dtype, target_block_bytes, n_cores):
    itemsize = jnp.dtype(dtype).itemsize
    sub = _sublane_multiple(dtype)
    # Constant block *bytes* (~2 MiB) regardless of dtype.
    block_elems = max(target_block_bytes // itemsize, sub * _LANES)

    # Column tile: full last dim when it fits the budget (always legal),
    # otherwise a multiple of 128 (partial edge block is clamped by Pallas).
    max_tc = block_elems // sub
    if cols <= max_tc:
        tc = cols
    else:
        tc = max((max_tc // _LANES) * _LANES, _LANES)

    # Row tile: multiple of the dtype's sublane quantum, or the full dim.
    if rows <= sub:
        tr = rows
    else:
        tr = max(block_elems // max(tc, 1), sub)
        tr = min(tr, rows)
        tr = max((tr // sub) * sub, sub)

    # Megacore: only on dual-TC parts, aim for >=4 grid steps per core so each
    # core's auto-pipeline still overlaps DMA with compute.  Single-TC chips
    # never pay forced-split overhead.
    if n_cores > 1 and rows > sub:
        col_steps = pl.cdiv(cols, tc)
        row_steps = pl.cdiv(rows, tr)
        target_steps = 4 * n_cores
        if row_steps * col_steps < target_steps:
            want_row_steps = pl.cdiv(target_steps, col_steps)
            tr_split = max(sub, _round_up(pl.cdiv(rows, want_row_steps), sub))
            tr = min(tr, tr_split)

    return tr, tc


def _gelu_2d(x2d: jax.Array, *, target_block_bytes: int) -> jax.Array:
    """Run the GELU kernel over a 2-D slab (partial edge blocks are clamped)."""
    rows, cols = x2d.shape
    dtype = x2d.dtype
    itemsize = jnp.dtype(dtype).itemsize
    tr, tc = _choose_tiles(rows, cols, dtype, target_block_bytes, _num_tensorcores())

    grid = (pl.cdiv(rows, tr), pl.cdiv(cols, tc))
    n_elems = rows * cols

    return pl.pallas_call(
        _gelu_kernel,
        out_shape=jax.ShapeDtypeStruct((rows, cols), dtype),
        grid_spec=pltpu.PrefetchScalarGridSpec(
            num_scalar_prefetch=0,
            grid=grid,
            # Partial edge blocks (ragged rows/cols) rely on Pallas clamping:
            # reads of the pad region are unspecified and the writeback is
            # masked — fine for this purely elementwise op (no cross-row /
            # cross-lane reduction over padded data).
            in_specs=[pl.BlockSpec((tr, tc), lambda i, j: (i, j))],
            out_specs=pl.BlockSpec((tr, tc), lambda i, j: (i, j)),
        ),
        compiler_params=pltpu.CompilerParams(
            dimension_semantics=("parallel", "parallel"),
        ),
        cost_estimate=pl.CostEstimate(
            flops=10 * n_elems,
            transcendentals=n_elems,
            bytes_accessed=2 * n_elems * itemsize,
        ),
    )(x2d)


def gelu(x: jax.Array, *, target_block_bytes: int = 2 * 1024 * 1024) -> jax.Array:
    """Tanh-approx GELU (elementwise), computed with a single Pallas TPU kernel."""
    orig_shape = x.shape
    n = x.size
    if n == 0:
        return x

    if x.ndim >= 2:
        cols = orig_shape[-1]
        rows = n // cols
    else:
        rows, cols = 1, n

    if n % _LANES == 0 and (cols < _LANES or x.ndim <= 1):
        # Lane-sparse last dim (or 1-D) with a 128-aligned total: a flat
        # (n/128, 128) view keeps loads/stores lane-dense.
        rows, cols = n // _LANES, _LANES
    # Otherwise: keep the original last dim (collapsing leading dims is
    # layout-preserving), so ragged totals need no slice / pad / concat —
    # exactly one HBM read + one HBM write.

    x2d = x.reshape(rows, cols)
    out2d = _gelu_2d(x2d, target_block_bytes=target_block_bytes)
    return out2d.reshape(orig_shape)


def _gelu_ref(x):
    # Pure-JAX reference matching the PyTorch module exactly (tanh approx).
    xf = x.astype(jnp.float32)
    y = 0.5 * xf * (1.0 + jnp.tanh(
        _SQRT_2_OVER_PI * (xf + 0.044715 * jnp.power(xf, 3))))
    return y.astype(x.dtype)


if __name__ == "__main__":
    key = jax.random.PRNGKey(0)

    # Small NCHW-shaped input (lane-sparse last dim, 128-aligned total).
    x = jax.random.normal(key, (2, 4, 16, 16), dtype=jnp.float32)
    out = jax.block_until_ready(gelu(x))
    assert out.shape == x.shape and out.dtype == x.dtype
    assert jnp.allclose(out, _gelu_ref(x), atol=1e-6, rtol=1e-6)

    # Ragged total size (not a multiple of 128): single-pass direct tiling,
    # no wrapper slice/pad/concat.
    x2 = jax.random.normal(jax.random.PRNGKey(1), (2, 3, 100), dtype=jnp.float32)
    out2 = jax.block_until_ready(gelu(x2))
    assert out2.shape == x2.shape and out2.dtype == x2.dtype
    assert jnp.allclose(out2, _gelu_ref(x2), atol=1e-6, rtol=1e-6)

    # bf16 path (dtype-preserving HBM traffic, f32 compute inside the kernel).
    x3 = jax.random.normal(jax.random.PRNGKey(2), (2, 8, 128), dtype=jnp.bfloat16)
    out3 = jax.block_until_ready(gelu(x3))
    assert out3.shape == x3.shape and out3.dtype == x3.dtype
    assert jnp.allclose(out3.astype(jnp.float32),
                        _gelu_ref(x3).astype(jnp.float32), atol=1e-2, rtol=1e-2)

    print("KERNEL_OK")
</pallas_src>

<mosaic_0001>
module attributes {stable_mosaic.version = 11 : i64} {
  func.func @_gelu_kernel(%arg0: i32, %arg1: i32, %arg2: memref<16x128xf32, #tpu.memory_space<vmem>>, %arg3: memref<16x128xf32, #tpu.memory_space<vmem>>) attributes {dimension_semantics = [#tpu.dimension_semantics<parallel>, #tpu.dimension_semantics<parallel>], iteration_bounds = array<i64: 1, 1>, scalar_prefetch = 0 : i64, scratch_operands = 0 : i64, tpu.core_type = #tpu.core_type<tc>, window_params = [{transform_indices = @transform_0, window_bounds = array<i64: 16, 128>}, {transform_indices = @transform_1, window_bounds = array<i64: 16, 128>}]} {
    %c0 = arith.constant 0 : index
    %c0_0 = arith.constant 0 : index
    %0 = vector.load %arg2[%c0, %c0_0] : memref<16x128xf32, #tpu.memory_space<vmem>>, vector<16x128xf32>
    %1 = arith.mulf %0, %0 : vector<16x128xf32>
    %2 = arith.mulf %1, %0 : vector<16x128xf32>
    %cst = arith.constant 4.471500e-02 : f32
    %3 = vector.broadcast %cst : f32 to vector<16x128xf32>
    %4 = arith.mulf %3, %2 : vector<16x128xf32>
    %5 = arith.addf %0, %4 : vector<16x128xf32>
    %cst_1 = arith.constant 0.797884583 : f32
    %6 = vector.broadcast %cst_1 : f32 to vector<16x128xf32>
    %7 = arith.mulf %6, %5 : vector<16x128xf32>
    %cst_2 = arith.constant 5.000000e-01 : f32
    %8 = vector.broadcast %cst_2 : f32 to vector<16x128xf32>
    %9 = arith.mulf %8, %0 : vector<16x128xf32>
    %10 = math.tanh %7 : vector<16x128xf32>
    %cst_3 = arith.constant 1.000000e+00 : f32
    %11 = vector.broadcast %cst_3 : f32 to vector<16x128xf32>
    %12 = arith.addf %11, %10 : vector<16x128xf32>
    %13 = arith.mulf %9, %12 : vector<16x128xf32>
    %c0_4 = arith.constant 0 : index
    %c0_5 = arith.constant 0 : index
    %14 = vector.load %arg3[%c0_4, %c0_5] : memref<16x128xf32, #tpu.memory_space<vmem>>, vector<16x128xf32>
    tpu.vector_store %arg3[%c0_4, %c0_5], %13 {strides = array<i32>} : memref<16x128xf32, #tpu.memory_space<vmem>>, vector<16x128xf32>,
    return
  }
  func.func @transform_0(%arg0: i32, %arg1: i32) -> (i32, i32) {
    %c0_i32 = arith.constant 0 : i32
    return %arg0, %arg1 : i32, i32
  }
  func.func @transform_1(%arg0: i32, %arg1: i32) -> (i32, i32) {
    %c0_i32 = arith.constant 0 : i32
    return %arg0, %arg1 : i32, i32
  }
}

</mosaic_0001>

<bundles_post_ra>
// kernel: tpu_custom_call.1
= control target key start
LH: loop header
LB: loop body
LE: loop exit
PB: predicated region body
PF: predicated region fallthrough
CT: control target
= control target key end

     0   :  { %6 = vsyncpa [#allocation3], 0  ;;  %s162_s0 = inlined_call_operand.hbm [shape: f32[16,128], index: 0, kind: input, shape index: {}]   ;;  %s163_s1 = inlined_call_operand.hbm [shape: f32[16,128], index: 1, kind: output, shape index: {}]  }
   0x1   :  { %7 = vsyncpa [#allocation4], 0  ;;  %s118_s6 = smov [#allocation2]   ;;  %s70_s10 = scalar_lea.hbm %s162_s0, 256 }
   0x2   :  { %s13_s7 = sshll.u32 %s118_s6, 4  ;;  %p71_p0 = scmp.ne.s32.totalorder %s162_s0, %s70_s10  ;;  %s14_s7 = int_to_ptr.vmem [resolvable:$true] %s13_s7 }
   0x3   :  { %p74_p1 = scmp.lt.u32.totalorder %s70_s10, %s162_s0 }
   0x5   :  { %p76_p2 = pnand %p74_p1, %p71_p0 }
   0x7   :  { %79 = shalt.err (!%p76_p2)
}
   0x8   :  { %s80_s15 = scalar_lea.vmem %s14_s7, 256  ;;  %p85_p4 = scmp.lt.s32.totalorder %s14_s7, %s14_s7 }
   0x9   :  { %p81_p3 = scmp.ne.s32.totalorder %s14_s7, %s80_s15  ;;  %p86_p5 = scmp.lt.s32.totalorder %s80_s15, %s80_s15 }
   0xb   :  { %p87_p6 = por %p86_p5, %p85_p4 }
   0xd   :  { %p88_p7 = pnand %p87_p6, %p81_p3 }
   0xf   :  { %91 = shalt.err (!%p88_p7)
}
  0x10   :  { %s119_s16 = smov 128   ;;  %s120_s17 = smov 8  }
  0x11   :  { %19 = dma.hbm_to_vmem [thread:$0]  %s162_s0, 256, %s14_s7, [#allocation3], %s119_s16, %s119_s16, %s120_s17  }
  0x12   :  { %114 = dma.done.wait [#allocation3], 256  }
  0x13   :  { %115 = vsyncadd [#allocation3], 4294967040  ;;  %v23_v0 = vld [vmem:[#allocation2] sm:$0xff]  ;;  %v24_v1 = vld [vmem:[#allocation2 + $0x8] sm:$0xff]  ;;  %s121_s0 = smov [#allocation5]  }
  0x14   :  { %v25_v2 = vmul.f32 %v23_v0, %v23_v0  ;;  %v26_v3 = vmul.f32 %v24_v1, %v24_v1  ;;  %v35_v12 = vmul.f32 0.5, %v23_v0  ;;  %v36_v14 = vmul.f32 0.5, %v24_v1  ;;  %s50_s20 = sshll.u32 %s121_s0, 4  ;;  %s51_s20 = int_to_ptr.vmem [resolvable:$true] %s50_s20 }
  0x15   :  { %s92_s21 = scalar_lea.vmem %s51_s20, 256  ;;  %p97_p9 = scmp.lt.s32.totalorder %s51_s20, %s51_s20 }
  0x16   :  { %v27_v4 = vmul.f32 %v25_v2, %v23_v0  ;;  %v28_v5 = vmul.f32 %v26_v3, %v24_v1  ;;  %p93_p8 = scmp.ne.s32.totalorder %s51_s20, %s92_s21  ;;  %p98_p10 = scmp.lt.s32.totalorder %s92_s21, %s92_s21 }
  0x18   :  { %v29_v6 = vmul.f32 0.044715, %v27_v4  ;;  %v30_v7 = vmul.f32 0.044715, %v28_v5  ;;  %p99_p11 = por %p98_p10, %p97_p9 }
  0x1a   :  { %v31_v8 = vadd.f32 %v29_v6, %v23_v0  ;;  %v32_v9 = vadd.f32 %v30_v7, %v24_v1  ;;  %p100_p12 = pnand %p99_p11, %p93_p8 }
  0x1c   :  { %v33_v10 = vmul.f32 0.7978846, %v31_v8  ;;  %v34_v11 = vmul.f32 0.7978846, %v32_v9 }
  0x1e   :  { %66 = vtanh.f32 %v33_v10 }
  0x1f   :  { %68 = vtanh.f32 %v34_v11 }
  0x28   :  { %v67_v13 = vpop.eup %66 }
  0x29   :  { %v69_v15 = vpop.eup %68  ;;  %v39_v16 = vadd.f32 1.0, %v67_v13 }
  0x2a   :  { %v40_v17 = vadd.f32 1.0, %v69_v15 }
  0x2b   :  { %v41_v18 = vmul.f32 %v39_v16, %v35_v12 }
  0x2c   :  { %v42_v19 = vmul.f32 %v40_v17, %v36_v14 }
  0x2d   :  { %43 = vst [vmem:[#allocation5] sm:$0xff] %v41_v18 }
  0x2e   :  { %44 = vst [vmem:[#allocation5 + $0x8] sm:$0xff] %v42_v19 }
  0x2f   :  { %103 = shalt.err (!%p100_p12)
}
  0x30   :  { %s104_s24 = scalar_lea.hbm %s163_s1, 256 }
  0x31   :  { %p105_p13 = scmp.ne.s32.totalorder %s163_s1, %s104_s24  ;;  %p108_p0 = scmp.lt.u32.totalorder %s104_s24, %s163_s1 }
  0x33   :  { %p110_p1 = pnand %p108_p0, %p105_p13 }
  0x35   :  { %113 = shalt.err (!%p110_p1)
}
  0x36   :  { %56 = dma.vmem_to_hbm [thread:$0]  %s51_s20, 256, %s163_s1, [#allocation4], %s119_s16, %s119_s16, %s120_s17  }
  0x37   :  { %116 = dma.done.wait [#allocation4], 256  }
  0x38   :  { %117 = vsyncadd [#allocation4], 4294967040 }
  0x39   :  { %60 = vsyncpa [#allocation3], 1 }
  0x3a   :  { %61 = vsyncpa [#allocation4], 1 }

</bundles_post_ra>
